<compile_context>
chip_gen: v7x
topology: tpu7x:2x2x1
jax: 0.10.0
libtpu: 0.0.40
codegen_flags: <defaults>
</compile_context>

<pallas_src>
import functools

import jax
import jax.numpy as jnp
import numpy as np
from jax.experimental import pallas as pl
from jax.experimental.pallas import tpu as pltpu

NUM_TOPICS = 25
ATTN_SIZE = 40
LANE = 128
BLOCK_CAP = 4096   # batch rows per grid step when tiling very large batches


# -----------------------------------------------------------------------------
# Kernel: one fused matmul + FMA + class softmax, fully lane-dense.
#   e_ref  : (2K+1, bb)   rows 0..24 reviewer emb, 25..49 submitter emb, 50 = 1
#   w_ref  : (2C+1, 2K+1) folded weights (see prepare_params)
#   out_ref: (C, bb)      class probabilities, batch on the lane axis
# -----------------------------------------------------------------------------
def match_classify_kernel(e_ref, w_ref, out_ref, *, approx_recip):
    n_classes = out_ref.shape[0]

    # Single MXU pass: everything the forward needs comes out of one matmul.
    full = jnp.dot(w_ref[...], e_ref[...],
                   preferred_element_type=jnp.float32)          # (2C+1, bb)

    a = full[:n_classes]                # W_out @ reviewer_emb
    zv = full[n_classes:n_classes + 1]  # colsum(W_V) . reviewer_emb (per column)
    b = full[n_classes + 1:]            # (W_out @ W_sub) @ submitter_emb + bias

    logits = a * zv + b                                          # (C, bb)

    # Softmax over classes == a C-row sublane reduction.
    m = jnp.max(logits, axis=0, keepdims=True)
    e = jnp.exp(logits - m)
    denom = jnp.sum(e, axis=0, keepdims=True)
    if approx_recip:
        out_ref[...] = e * pl.reciprocal(denom, approx=True)     # EUP slot
    else:
        out_ref[...] = e / denom


# -----------------------------------------------------------------------------
# Wrapper
# -----------------------------------------------------------------------------
def _ceil_to(x, m):
    return -(-x // m) * m


def _choose_tiling(batch, block_cap):
    """Pad the batch to the lane width and pick a block size.

    One grid step whenever the padded batch fits under `block_cap`; otherwise
    tile at `block_cap` rows (bounds per-step VMEM on v7x's 64 MiB and gives
    multi-TensorCore chips >= 2 parallel grid steps on very large batches).
    """
    block_cap = max(LANE, (block_cap // LANE) * LANE)
    b_lane = _ceil_to(batch, LANE)
    block_b = b_lane if b_lane <= block_cap else block_cap
    b_pad = _ceil_to(batch, block_b)
    return block_b, b_pad


def match_classify(submitter_rows, reviewer_rows, folded, *,
                   block_cap=BLOCK_CAP, approx_recip=True):
    """submitter_rows, reviewer_rows: (B, 25) float32.  Each row is one
    independent (submitter, reviewer) pair evaluated exactly like the PyTorch
    module's batch-1 forward.  Returns (B, n_classes) class probabilities.

    Set approx_recip=False if consumers require rows that sum to exactly 1.
    """
    w_full = folded["W_full"]                       # (2C+1, 2K+1)
    n_classes = (w_full.shape[0] - 1) // 2
    k2 = w_full.shape[1]                            # 2*NUM_TOPICS + 1
    batch = submitter_rows.shape[0]

    block_b, b_pad = _choose_tiling(batch, block_cap)
    grid = (b_pad // block_b,)

    # Lane-dense stacked input: (2K+1, B_pad), batch on the 128-lane axis.
    # (Wrapper-side transpose/concat is layout plumbing outside the kernel.)
    ones = jnp.ones((batch, 1), jnp.float32)
    e_rows = jnp.concatenate(
        [reviewer_rows.astype(jnp.float32),
         submitter_rows.astype(jnp.float32), ones], axis=1)      # (B, 2K+1)
    if b_pad != batch:
        e_rows = jnp.pad(e_rows, ((0, b_pad - batch), (0, 0)))
    e_full = e_rows.T                                            # (2K+1, B_pad)

    out = pl.pallas_call(
        functools.partial(match_classify_kernel, approx_recip=approx_recip),
        out_shape=jax.ShapeDtypeStruct((n_classes, b_pad), jnp.float32),
        grid=grid,
        in_specs=[
            pl.BlockSpec((k2, block_b), lambda i: (0, i)),       # stacked emb
            pl.BlockSpec(w_full.shape, lambda i: (0, 0)),        # folded weights
        ],
        out_specs=pl.BlockSpec((n_classes, block_b), lambda i: (0, i)),
        compiler_params=pltpu.CompilerParams(
            dimension_semantics=("parallel",)),  # v7x: shard steps over both TCs
    )(e_full, w_full)

    return out.T[:batch]                                         # (B, C)


# -----------------------------------------------------------------------------
# Parameter construction / folding (paid once, outside the hot path)
# -----------------------------------------------------------------------------
def init_params(key, n_classes):
    ks = jax.random.split(key, 7)
    b = 1.0 / np.sqrt(NUM_TOPICS)
    return {
        # torch.rand -> uniform [0, 1)
        "W_Q": jax.random.uniform(ks[0], (ATTN_SIZE, NUM_TOPICS), jnp.float32),
        "W_K": jax.random.uniform(ks[1], (ATTN_SIZE, NUM_TOPICS), jnp.float32),
        "W_V": jax.random.uniform(ks[2], (ATTN_SIZE, NUM_TOPICS), jnp.float32),
        # nn.Linear(25, 25)
        "w_sub_w": jax.random.uniform(ks[3], (NUM_TOPICS, NUM_TOPICS),
                                      jnp.float32, minval=-b, maxval=b),
        "w_sub_b": jax.random.uniform(ks[4], (NUM_TOPICS,), jnp.float32,
                                      minval=-b, maxval=b),
        # nn.Linear(25, n_classes)
        "w_out_w": jax.random.uniform(ks[5], (n_classes, NUM_TOPICS),
                                      jnp.float32, minval=-b, maxval=b),
        "w_out_b": jax.random.uniform(ks[6], (n_classes,), jnp.float32,
                                      minval=-b, maxval=b),
        # NOTE: the module's `combined` Linear is defined but never used in
        # forward, so it is intentionally omitted.
    }


def prepare_params(params):
    """Fold the whole forward into one (2C+1, 2K+1) weight (runs once, XLA)."""
    W_V = params["W_V"]
    W_sub, b_sub = params["w_sub_w"], params["w_sub_b"]
    W_out, b_out = params["w_out_w"], params["w_out_b"]
    n_classes = W_out.shape[0]
    K = NUM_TOPICS

    wv_colsum = jnp.sum(W_V, axis=0)        # zv = colsum(W_V) . r  (Q/K are dead)
    m_sub = W_out @ W_sub                   # folded submitter Linear
    bias = W_out @ b_sub + b_out            # folded bias (carried by ones-row)

    w_full = jnp.zeros((2 * n_classes + 1, 2 * K + 1), jnp.float32)
    w_full = w_full.at[:n_classes, :K].set(W_out)
    w_full = w_full.at[n_classes, :K].set(wv_colsum)
    w_full = w_full.at[n_classes + 1:, K:2 * K].set(m_sub)
    w_full = w_full.at[n_classes + 1:, 2 * K].set(bias)
    return {"W_full": w_full}


# -----------------------------------------------------------------------------
# Pure-JAX reference: the FULL original torch math (incl. the dead Q/K branch),
# vectorized over independent pairs.
# -----------------------------------------------------------------------------
def reference_jax(s_rows, r_rows, params):
    Q = s_rows @ params["W_Q"].T                       # (B, 40)
    K = r_rows @ params["W_K"].T                       # (B, 40)
    V = r_rows @ params["W_V"].T                       # (B, 40)
    s = jnp.sum(Q * K, axis=1, keepdims=True)          # per-pair scalar score
    z = jnp.exp(s - s)                                 # softmax of a scalar == 1
    zv = jnp.sum(z * V, axis=1, keepdims=True)         # (B, 1)
    x = zv * r_rows                                    # (B, 25)
    combine = x + s_rows @ params["w_sub_w"].T + params["w_sub_b"]
    out = combine @ params["w_out_w"].T + params["w_out_b"]
    return jax.nn.softmax(out, axis=1)


if __name__ == "__main__":
    n_classes = 4
    key = jax.random.PRNGKey(0)
    k_param, k_s1, k_r1, k_sb, k_rb = jax.random.split(key, 5)

    params = init_params(k_param, n_classes)
    folded = prepare_params(params)

    # ---- batch = 1: exactly the PyTorch module's forward ----
    s1 = jax.random.uniform(k_s1, (1, NUM_TOPICS), jnp.float32)
    r1 = jax.random.uniform(k_r1, (1, NUM_TOPICS), jnp.float32)
    out1 = jax.block_until_ready(match_classify(s1, r1, folded))
    ref1 = reference_jax(s1, r1, params)
    # tolerance covers the approx-EUP reciprocal in the softmax epilogue
    np.testing.assert_allclose(np.asarray(out1), np.asarray(ref1),
                               rtol=2e-3, atol=2e-3)
    assert out1.shape == (1, n_classes)

    # ---- batched: non-128-divisible batch, forced multi-step grid path ----
    B = 300
    sB = jax.random.uniform(k_sb, (B, NUM_TOPICS), jnp.float32)
    rB = jax.random.uniform(k_rb, (B, NUM_TOPICS), jnp.float32)
    outB = jax.block_until_ready(
        match_classify(sB, rB, folded, block_cap=128))   # grid=(3,), padded tail
    refB = reference_jax(sB, rB, params)
    np.testing.assert_allclose(np.asarray(outB), np.asarray(refB),
                               rtol=2e-3, atol=2e-3)
    assert outB.shape == (B, n_classes)

    print("KERNEL_OK")
</pallas_src>

<mosaic_0001>
module attributes {stable_mosaic.version = 11 : i64} {
  func.func @match_classify_kernel(%arg0: i32, %arg1: memref<51x128xf32, #tpu.memory_space<vmem>>, %arg2: memref<9x51xf32, #tpu.memory_space<vmem>>, %arg3: memref<4x128xf32, #tpu.memory_space<vmem>>) attributes {dimension_semantics = [#tpu.dimension_semantics<parallel>], iteration_bounds = array<i64: 1>, scalar_prefetch = 0 : i64, scratch_operands = 0 : i64, tpu.core_type = #tpu.core_type<tc>, window_params = [{transform_indices = @transform_0, window_bounds = array<i64: 51, 128>}, {pipeline_mode = #tpu.pipeline_mode<synchronous>, transform_indices = @transform_1, window_bounds = array<i64: 9, 51>}, {transform_indices = @transform_2, window_bounds = array<i64: 4, 128>}]} {
    %c0 = arith.constant 0 : index
    %c0_0 = arith.constant 0 : index
    %0 = vector.load %arg2[%c0, %c0_0] : memref<9x51xf32, #tpu.memory_space<vmem>>, vector<9x51xf32>
    %c0_1 = arith.constant 0 : index
    %c0_2 = arith.constant 0 : index
    %1 = vector.load %arg1[%c0_1, %c0_2] : memref<51x128xf32, #tpu.memory_space<vmem>>, vector<51x128xf32>
    %cst = arith.constant dense<0.000000e+00> : vector<9x128xf32>
    %2 = tpu.matmul %0, %1, %cst {dimension_numbers = #tpu.dot_dimension_numbers<[1], [0], [0], [1], [0, 0, 1, 1], [], []>} : vector<9x51xf32>, vector<51x128xf32>, vector<9x128xf32> -> vector<9x128xf32>
    %3 = vector.extract_strided_slice %2 {offsets = [0, 0], sizes = [4, 128], strides = [1, 1]} : vector<9x128xf32> to vector<4x128xf32>
    %4 = vector.extract_strided_slice %2 {offsets = [4, 0], sizes = [1, 128], strides = [1, 1]} : vector<9x128xf32> to vector<1x128xf32>
    %5 = vector.extract_strided_slice %2 {offsets = [5, 0], sizes = [4, 128], strides = [1, 1]} : vector<9x128xf32> to vector<4x128xf32>
    %6 = vector.broadcast %4 : vector<1x128xf32> to vector<4x128xf32>
    %7 = arith.mulf %3, %6 : vector<4x128xf32>
    %8 = arith.addf %7, %5 : vector<4x128xf32>
    %cst_3 = arith.constant dense<0xFF800000> : vector<128xf32>
    %9 = vector.multi_reduction <maximumf>, %8, %cst_3 [0] : vector<4x128xf32> to vector<128xf32>
    %10 = vector.shape_cast %9 : vector<128xf32> to vector<1x128xf32>
    %11 = vector.broadcast %10 : vector<1x128xf32> to vector<4x128xf32>
    %12 = arith.subf %8, %11 : vector<4x128xf32>
    %13 = math.exp %12 : vector<4x128xf32>
    %cst_4 = arith.constant dense<0.000000e+00> : vector<128xf32>
    %14 = vector.multi_reduction <add>, %13, %cst_4 [0] : vector<4x128xf32> to vector<128xf32>
    %15 = vector.shape_cast %14 : vector<128xf32> to vector<1x128xf32>
    %16 = tpu.reciprocal %15 {approx = true} : vector<1x128xf32> -> vector<1x128xf32>
    %17 = vector.broadcast %16 : vector<1x128xf32> to vector<4x128xf32>
    %18 = arith.mulf %13, %17 : vector<4x128xf32>
    %c0_5 = arith.constant 0 : index
    %c0_6 = arith.constant 0 : index
    %19 = vector.load %arg3[%c0_5, %c0_6] : memref<4x128xf32, #tpu.memory_space<vmem>>, vector<4x128xf32>
    tpu.vector_store %arg3[%c0_5, %c0_6], %18 {strides = array<i32>} : memref<4x128xf32, #tpu.memory_space<vmem>>, vector<4x128xf32>,
    return
  }
  func.func @transform_0(%arg0: i32) -> (i32, i32) {
    %c0_i32 = arith.constant 0 : i32
    %c0_i32_0 = arith.constant 0 : i32
    return %c0_i32, %arg0 : i32, i32
  }
  func.func @transform_1(%arg0: i32) -> (i32, i32) {
    %c0_i32 = arith.constant 0 : i32
    %c0_i32_0 = arith.constant 0 : i32
    %c0_i32_1 = arith.constant 0 : i32
    return %c0_i32, %c0_i32_0 : i32, i32
  }
  func.func @transform_2(%arg0: i32) -> (i32, i32) {
    %c0_i32 = arith.constant 0 : i32
    %c0_i32_0 = arith.constant 0 : i32
    return %c0_i32, %arg0 : i32, i32
  }
}

</mosaic_0001>

<bundles_post_ra>
// kernel: tpu_custom_call.1
= control target key start
LH: loop header
LB: loop body
LE: loop exit
PB: predicated region body
PF: predicated region fallthrough
CT: control target
= control target key end

     0   :  { %7 = vsyncpa [#allocation3], 0  ;;  %s364_s0 = inlined_call_operand.hbm [shape: f32[51,128], index: 0, kind: input, shape index: {}]   ;;  %s365_s1 = inlined_call_operand.hbm [shape: f32[9,51], index: 1, kind: input, shape index: {}]   ;;  %s366_s2 = inlined_call_operand.hbm [shape: f32[4,128], index: 2, kind: output, shape index: {}]  }
   0x1   :  { %8 = vsyncpa [#allocation6], 0 }
   0x2   :  { %9 = vsyncpa [#allocation4], 0  ;;  %s306_s9 = smov [#allocation2]   ;;  %s234_s13 = scalar_lea.hbm %s364_s0, 896 }
   0x3   :  { %s15_s10 = sshll.u32 %s306_s9, 4  ;;  %p235_p0 = scmp.ne.s32.totalorder %s364_s0, %s234_s13  ;;  %s16_s10 = int_to_ptr.vmem [resolvable:$true] %s15_s10 }
   0x4   :  { %p238_p1 = scmp.lt.u32.totalorder %s234_s13, %s364_s0 }
   0x6   :  { %p240_p2 = pnand %p238_p1, %p235_p0 }
   0x8   :  { %243 = shalt.err (!%p240_p2)
}
   0x9   :  { %s244_s18 = scalar_lea.vmem %s16_s10, 896  ;;  %p249_p4 = scmp.lt.s32.totalorder %s16_s10, %s16_s10 }
   0xa   :  { %p245_p3 = scmp.ne.s32.totalorder %s16_s10, %s244_s18  ;;  %p250_p5 = scmp.lt.s32.totalorder %s244_s18, %s244_s18 }
   0xc   :  { %p251_p6 = por %p250_p5, %p249_p4 }
   0xe   :  { %p252_p7 = pnand %p251_p6, %p245_p3 }
  0x10   :  { %255 = shalt.err (!%p252_p7)
}
  0x11   :  { %s307_s19 = smov 128   ;;  %s308_s20 = smov 8  }
  0x12   :  { %21 = dma.hbm_to_vmem [thread:$0]  %s364_s0, 896, %s16_s10, [#allocation3], %s307_s19, %s307_s19, %s308_s20  }
  0x13   :  { %s309_s23 = smov [#allocation5]   ;;  %s256_s27 = scalar_lea.hbm %s365_s1, 256 }
  0x14   :  { %s27_s24 = sshll.u32 %s309_s23, 4  ;;  %p257_p8 = scmp.ne.s32.totalorder %s365_s1, %s256_s27  ;;  %s28_s24 = int_to_ptr.vmem [resolvable:$true] %s27_s24 }
  0x15   :  { %p260_p9 = scmp.lt.u32.totalorder %s256_s27, %s365_s1 }
  0x17   :  { %p262_p10 = pnand %p260_p9, %p257_p8 }
  0x19   :  { %265 = shalt.err (!%p262_p10)
}
  0x1a   :  { %s266_s4 = scalar_lea.vmem %s28_s24, 256  ;;  %p271_p12 = scmp.lt.s32.totalorder %s28_s24, %s28_s24 }
  0x1b   :  { %p267_p11 = scmp.ne.s32.totalorder %s28_s24, %s266_s4  ;;  %p272_p13 = scmp.lt.s32.totalorder %s266_s4, %s266_s4 }
  0x1d   :  { %p273_p0 = por %p272_p13, %p271_p12 }
  0x1f   :  { %p274_p1 = pnand %p273_p0, %p267_p11 }
  0x21   :  { %277 = shalt.err (!%p274_p1)
}
  0x22   :  { %33 = dma.hbm_to_vmem [thread:$0]  %s365_s1, 256, %s28_s24, [#allocation6], %s307_s19, %s307_s19, %s308_s20  }
  0x23   :  { %300 = dma.done.wait [#allocation3], 896  }
  0x24   :  { %301 = vsyncadd [#allocation3], 4294966400 }
  0x25   :  { %302 = dma.done.wait [#allocation6], 256  }
  0x26   :  { %303 = vsyncadd [#allocation6], 4294967040  ;;  %v42_v0 = vld [vmem:[#allocation2] sm:$0xff]  ;;  %v43_v1 = vld [vmem:[#allocation2 + $0x8] sm:$0xff]  ;;  %vm49_vm0 = vcmask 416768   ;;  %vm56_vm1 = vcmask 1042432   ;;  %v135_v12 = vlaneseq }
  0x27   :  { %v44_v2 = vld [vmem:[#allocation2 + $0x10] sm:$0xff]  ;;  %v213_v3 = vpack.c.bf16 %v43_v1, %v42_v0  ;;  %v45_v4 = vld [vmem:[#allocation2 + $0x18] sm:$0xff]  ;;  %v46_v6 = vld [vmem:[#allocation2 + $0x20] sm:$0xff]  ;;  %vm147_vm2 = vcmask 1043456   ;;  %s310_s1 = smov [#allocation7]  }
  0x28   :  { %v217_v5 = vpack.c.bf16 %v45_v4, %v44_v2  ;;  %v47_v7 = vld [vmem:[#allocation2 + $0x28] sm:$0xff]  ;;  %v40_v8 = vld [vmem:[#allocation5] sm:$0xff]  ;;  %v48_v10 = vld [vmem:[#allocation2 + $0x30] sm:$0x7]  ;;  %v136_v13 = vshrl.u32 %v135_v12, 7  ;;  %s174_s6 = sshll.u32 %s310_s1, 4  ;;  %s175_s6 = int_to_ptr.vmem [resolvable:$true] %s174_s6 }
  0x29   :  { %214 = vmatprep.subr.bf16.mxu0 %v213_v3  ;;  %210 = vmatprep.mubr.msk.f32.mxu0 %vm49_vm0, %v40_v8  ;;  %v221_v9 = vpack.c.bf16 %v47_v7, %v46_v6  ;;  %v41_v11 = vld [vmem:[#allocation5 + $0x8] sm:$0x1]  ;;  %s278_s7 = scalar_lea.vmem %s175_s6, 64  ;;  %p283_p3 = scmp.lt.s32.totalorder %s175_s6, %s175_s6 }
  0x2a   :  { %216 = vmatpush3.bf16.msra.mxu0 %v213_v3  ;;  %v137_v14 = vsub.s32 4, %v136_v13  ;;  %p279_p2 = scmp.ne.s32.totalorder %s175_s6, %s278_s7  ;;  %p284_p4 = scmp.lt.s32.totalorder %s278_s7, %s278_s7 }
  0x2b   :  { %218 = vmatprep.subr.bf16.mxu0 %v217_v5 }
  0x2c   :  { %p285_p5 = por %p284_p4, %p283_p3 }
  0x2e   :  { %220 = vmatpush3.bf16.msra.mxu0 %v217_v5  ;;  %p286_p6 = pnand %p285_p5, %p279_p2 }
  0x2f   :  { %222 = vmatprep.subr.bf16.mxu0 %v221_v9 }
  0x32   :  { %224 = vmatpush3.bf16.msra.mxu0 %v221_v9 }
  0x33   :  { %208 = vmatprep.subr.msk.mxu0 %vm56_vm1, %v48_v10 }
  0x36   :  { %209 = vmatpush3.msk.msra.mxu0 %vm56_vm1, %v48_v10 }
  0x37   :  { %211 = vmatmul.mubr.msk.f32.vlgmr.msra.gmra.mrb[0].mxu0 %vm49_vm0, %v41_v11 }
 0x10a   :  { %v212_v15 = vpop.f32.mrb[0].mxu0 }
 0x10b   :  { %v143_v16 = vrot.slane %v212_v15, 5  ;;  %v126_v17 = vpop.f32.mrb[1].mxu0 }
 0x10c   :  { %v138_v18 = vrot.slane %v126_v17, %v137_v14  ;;  %v142_v19 = vrot.slane %v126_v17, 5 }
 0x10e   :  { %v139_v20 = vmul.f32 %v138_v18, %v126_v17  ;;  %v144_v21 = vsel %vm56_vm1, %v142_v19, %v143_v16 }
 0x110   :  { %v146_v22 = vadd.f32 %v144_v21, %v139_v20 }
 0x112   :  { %v148_v23 = vsel %vm147_vm2, %v146_v22, -inf }
 0x113   :  { %v149_v24 = vrot.slane %v148_v23, 4 }
 0x115   :  { %v150_v25 = vmax.f32 %v148_v23, %v149_v24 }
 0x117   :  { %v151_v26 = vrot.slane %v150_v25, 2 }
 0x119   :  { %v152_v27 = vmax.f32 %v150_v25, %v151_v26 }
 0x11b   :  { %v153_v28 = vrot.slane %v152_v27, 1 }
 0x11d   :  { %v154_v29 = vmax.f32 %v152_v27, %v153_v28 }
 0x11f   :  { %v155_v30 = vsub.f32 %v146_v22, %v154_v29 }
 0x121   :  { %v156_v31 = vmul.f32 1.442695, %v155_v30 }
 0x123   :  { %230 = vpow2.f32 %v156_v31 }
 0x12d   :  { %v231_v32 = vpop.eup %230 }
 0x12e   :  { %v158_v33 = vsel %vm147_vm2, %v231_v32, 0.0 }
 0x12f   :  { %v159_v34 = vrot.slane %v158_v33, 4 }
 0x131   :  { %v160_v35 = vadd.f32 %v159_v34, %v158_v33 }
 0x133   :  { %v161_v36 = vrot.slane %v160_v35, 2 }
 0x135   :  { %v162_v37 = vadd.f32 %v161_v36, %v160_v35 }
 0x137   :  { %v163_v38 = vrot.slane %v162_v37, 1 }
 0x139   :  { %v164_v39 = vadd.f32 %v163_v38, %v162_v37 }
 0x13b   :  { %232 = vrcp.f32 %v164_v39 }
 0x145   :  { %v233_v40 = vpop.eup %232 }
 0x146   :  { %v166_v41 = vmul.f32 %v233_v40, %v231_v32 }
 0x148   :  { %167 = vst [vmem:[#allocation7] sm:$0xf] %v166_v41 }
 0x149   :  { %289 = shalt.err (!%p286_p6)
}
 0x14a   :  { %s290_s10 = scalar_lea.hbm %s366_s2, 64 }
 0x14b   :  { %p291_p7 = scmp.ne.s32.totalorder %s366_s2, %s290_s10  ;;  %p294_p8 = scmp.lt.u32.totalorder %s290_s10, %s366_s2 }
 0x14d   :  { %p296_p9 = pnand %p294_p8, %p291_p7 }
 0x14f   :  { %299 = shalt.err (!%p296_p9)
}
 0x150   :  { %177 = dma.vmem_to_hbm [thread:$0]  %s175_s6, 64, %s366_s2, [#allocation4]  }
 0x151   :  { %304 = dma.done.wait [#allocation4], 64  }
 0x152   :  { %305 = vsyncadd [#allocation4], 4294967232 }
 0x153   :  { %181 = vsyncpa [#allocation3], 1 }
 0x154   :  { %182 = vsyncpa [#allocation6], 1 }
 0x155   :  { %183 = vsyncpa [#allocation4], 1 }

</bundles_post_ra>
